<compile_context>
chip_gen: v6e
topology: v6e:2x2x1
jax: 0.10.0
libtpu: 0.0.40
codegen_flags: <defaults>
</compile_context>

<pallas_src>
import functools

import jax
import jax.numpy as jnp
from jax import lax
from jax.experimental import pallas as pl
from jax.experimental.pallas import tpu as pltpu

KSIZE = 3
_LANE = 128


def _dsc_kernel(x_ref, dw_ref, db_ref, pw_ref, pb_ref, o_ref, *, width, ksize):
    # x_ref : (C_in, N)      N = Bt*H*W  (channels in sublanes, pixels in lanes)
    # dw_ref: (C_in, K*K)    depthwise taps (flattened)
    # db_ref: (C_in, 1)      depthwise bias
    # pw_ref: (C_out, C_in)  pointwise weights
    # pb_ref: (C_out, 1)     pointwise bias
    # o_ref : (C_out, N)
    c_in, n = x_ref.shape
    c_out = o_ref.shape[0]

    x = x_ref[...].astype(jnp.float32)
    dw = dw_ref[...].astype(jnp.float32)
    db = db_ref[...].astype(jnp.float32)
    pw = pw_ref[...].astype(jnp.float32)
    pb = pb_ref[...].astype(jnp.float32)

    # Append one 128-lane zero tile so every tap offset (<= (K-1)*(W+1)) is an
    # in-bounds static slice; the concat is lane-aligned since n % 128 == 0.
    # Lanes whose KxK window crosses a row/image boundary produce garbage that
    # the wrapper slices away (only i<Ho, j<Wo positions are kept).
    x_pad = jnp.concatenate([x, jnp.zeros((c_in, _LANE), jnp.float32)], axis=1)

    # Depthwise KxK valid conv; bias folded into the accumulator init.
    acc = jnp.broadcast_to(db, (c_in, n))
    for ki in range(ksize):
        for kj in range(ksize):
            off = ki * width + kj
            t = ki * ksize + kj
            tap = dw[:, t:t + 1]                       # (C_in, 1)
            acc = acc + x_pad[:, off:off + n] * tap    # lane-shifted view

    # Pointwise 1x1 conv; bias folded into the init.
    if c_in <= 16:
        # Tiny channel count: C_in VPU outer-product FMAs; skip MXU push/pop.
        out = jnp.broadcast_to(pb, (c_out, n))
        for ci in range(c_in):
            out = out + pw[:, ci:ci + 1] * acc[ci:ci + 1, :]
    else:
        # Large channel count: N is a multiple of 128 -> real MXU work.
        # (On v6e/v7x cast operands to bf16 here once channels are >=128;
        # keep f32 accumulation via preferred_element_type.)
        out = jnp.dot(pw, acc, preferred_element_type=jnp.float32) + pb

    o_ref[...] = out.astype(o_ref.dtype)               # full-width, unmasked


def depthwise_separable_conv(x, dw, db, pw, pb, *,
                             vmem_budget_bytes=16 * 1024 * 1024):
    """x: (B, C_in, H, W); dw: (C_in, 1, K, K); db: (C_in,);
    pw: (C_out, C_in, 1, 1); pb: (C_out,). Returns (B, C_out, H-K+1, W-K+1)."""
    b, c_in, h, w = x.shape
    c_out = pw.shape[0]
    k = dw.shape[-1]
    assert dw.shape == (c_in, 1, k, k) and pw.shape == (c_out, c_in, 1, 1)
    assert h >= k and w >= k, "spatial dims must be >= kernel size"
    ho, wo = h - k + 1, w - k + 1
    hw = h * w

    # Lane-dense operands (wrapper-side layout plumbing).
    x2 = x.transpose(1, 0, 2, 3).reshape(c_in, b * hw)
    dw2 = dw.reshape(c_in, k * k)
    db2 = db.reshape(c_in, 1)
    pw2 = pw.reshape(c_out, c_in)
    pb2 = pb.reshape(c_out, 1)

    # Images per grid step: largest divisor of B whose working set (double
    # buffering + in-kernel temporaries) fits a conservative VMEM budget.
    # TODO(synk): for very large C*H*W (v7x: 64 MiB VMEM) add a row-tiled grid
    # axis with a (K-1)-row halo instead of whole images per step.
    bytes_per_img = hw * 4 * (6 * c_in + 4 * c_out)
    bt = b
    while bt > 1 and (b % bt != 0 or bt * bytes_per_img > vmem_budget_bytes):
        bt -= 1
    n = bt * hw
    grid = (b // bt,)

    kernel = functools.partial(_dsc_kernel, width=w, ksize=k)
    out_flat = pl.pallas_call(
        kernel,
        out_shape=jax.ShapeDtypeStruct((c_out, b * hw), x.dtype),
        grid_spec=pltpu.PrefetchScalarGridSpec(
            num_scalar_prefetch=0,
            grid=grid,
            in_specs=[
                pl.BlockSpec((c_in, n), lambda i: (0, i)),
                pl.BlockSpec((c_in, k * k), lambda i: (0, 0)),
                pl.BlockSpec((c_in, 1), lambda i: (0, 0)),
                pl.BlockSpec((c_out, c_in), lambda i: (0, 0)),
                pl.BlockSpec((c_out, 1), lambda i: (0, 0)),
            ],
            out_specs=pl.BlockSpec((c_out, n), lambda i: (0, i)),
        ),
        compiler_params=pltpu.CompilerParams(
            dimension_semantics=("parallel",),
            # Raise the scoped-VMEM limit (v5e default is only 16 MiB) while
            # staying well under v7x's 64 MiB physical VMEM.
            vmem_limit_bytes=48 * 1024 * 1024,
        ),
    )(x2, dw2, db2, pw2, pb2)

    # (C_out, B*H*W) -> (B, C_out, H, W), then keep only the valid conv region.
    out = out_flat.reshape(c_out, b, h, w).transpose(1, 0, 2, 3)
    return out[:, :, :ho, :wo]


def _reference(x, dw, db, pw, pb):
    # Pure-JAX reference matching PyTorch Conv2d semantics.
    c_in = x.shape[1]
    y = lax.conv_general_dilated(
        x, dw, window_strides=(1, 1), padding="VALID",
        dimension_numbers=("NCHW", "OIHW", "NCHW"),
        feature_group_count=c_in)
    y = y + db[None, :, None, None]
    z = lax.conv_general_dilated(
        y, pw, window_strides=(1, 1), padding="VALID",
        dimension_numbers=("NCHW", "OIHW", "NCHW"))
    z = z + pb[None, :, None, None]
    return z


if __name__ == "__main__":
    key = jax.random.PRNGKey(0)
    kx, kdw, kdb, kpw, kpb = jax.random.split(key, 5)

    B, C_IN, C_OUT, H, W = 2, 4, 8, 16, 16

    x = jax.random.normal(kx, (B, C_IN, H, W), dtype=jnp.float32)
    # Parameter shapes match nn.Conv2d(ch_in, ch_in, 3, groups=ch_in) and
    # nn.Conv2d(ch_in, ch_out, 1): weights (C_in,1,3,3)/(C_out,C_in,1,1), biases.
    dw = jax.random.normal(kdw, (C_IN, 1, KSIZE, KSIZE), dtype=jnp.float32) * 0.1
    db = jax.random.normal(kdb, (C_IN,), dtype=jnp.float32) * 0.1
    pw = jax.random.normal(kpw, (C_OUT, C_IN, 1, 1), dtype=jnp.float32) * 0.1
    pb = jax.random.normal(kpb, (C_OUT,), dtype=jnp.float32) * 0.1

    out = depthwise_separable_conv(x, dw, db, pw, pb)
    out = jax.block_until_ready(out)

    ref = _reference(x, dw, db, pw, pb)
    assert out.shape == (B, C_OUT, H - KSIZE + 1, W - KSIZE + 1)
    assert jnp.allclose(out, ref, atol=1e-4, rtol=1e-4), "mismatch vs reference"

    print("KERNEL_OK")
</pallas_src>

<mosaic_0001>
module attributes {stable_mosaic.version = 11 : i64} {
  func.func @_dsc_kernel(%arg0: i32, %arg1: memref<4x512xf32, #tpu.memory_space<vmem>>, %arg2: memref<4x9xf32, #tpu.memory_space<vmem>>, %arg3: memref<4x1xf32, #tpu.memory_space<vmem>>, %arg4: memref<8x4xf32, #tpu.memory_space<vmem>>, %arg5: memref<8x1xf32, #tpu.memory_space<vmem>>, %arg6: memref<8x512xf32, #tpu.memory_space<vmem>>) attributes {dimension_semantics = [#tpu.dimension_semantics<parallel>], iteration_bounds = array<i64: 1>, scalar_prefetch = 0 : i64, scratch_operands = 0 : i64, tpu.core_type = #tpu.core_type<tc>, window_params = [{transform_indices = @transform_0, window_bounds = array<i64: 4, 512>}, {pipeline_mode = #tpu.pipeline_mode<synchronous>, transform_indices = @transform_1, window_bounds = array<i64: 4, 9>}, {pipeline_mode = #tpu.pipeline_mode<synchronous>, transform_indices = @transform_2, window_bounds = array<i64: 4, 1>}, {pipeline_mode = #tpu.pipeline_mode<synchronous>, transform_indices = @transform_3, window_bounds = array<i64: 8, 4>}, {pipeline_mode = #tpu.pipeline_mode<synchronous>, transform_indices = @transform_4, window_bounds = array<i64: 8, 1>}, {transform_indices = @transform_5, window_bounds = array<i64: 8, 512>}]} {
    %c0 = arith.constant 0 : index
    %c0_0 = arith.constant 0 : index
    %0 = vector.load %arg1[%c0, %c0_0] : memref<4x512xf32, #tpu.memory_space<vmem>>, vector<4x512xf32>
    %c0_1 = arith.constant 0 : index
    %c0_2 = arith.constant 0 : index
    %1 = vector.load %arg2[%c0_1, %c0_2] : memref<4x9xf32, #tpu.memory_space<vmem>>, vector<4x9xf32>
    %c0_3 = arith.constant 0 : index
    %c0_4 = arith.constant 0 : index
    %2 = vector.load %arg3[%c0_3, %c0_4] : memref<4x1xf32, #tpu.memory_space<vmem>>, vector<4x1xf32>
    %c0_5 = arith.constant 0 : index
    %c0_6 = arith.constant 0 : index
    %3 = vector.load %arg4[%c0_5, %c0_6] : memref<8x4xf32, #tpu.memory_space<vmem>>, vector<8x4xf32>
    %c0_7 = arith.constant 0 : index
    %c0_8 = arith.constant 0 : index
    %4 = vector.load %arg5[%c0_7, %c0_8] : memref<8x1xf32, #tpu.memory_space<vmem>>, vector<8x1xf32>
    %cst = arith.constant 0.000000e+00 : f32
    %5 = vector.broadcast %cst : f32 to vector<4x128xf32>
    %6 = tpu.concatenate %0, %5 in 1 : vector<4x512xf32>, vector<4x128xf32> -> vector<4x640xf32>
    %7 = vector.shape_cast %2 : vector<4x1xf32> to vector<4x1xf32>
    %8 = vector.broadcast %7 : vector<4x1xf32> to vector<4x512xf32>
    %9 = vector.extract_strided_slice %1 {offsets = [0, 0], sizes = [4, 1], strides = [1, 1]} : vector<4x9xf32> to vector<4x1xf32>
    %10 = vector.extract_strided_slice %6 {offsets = [0, 0], sizes = [4, 512], strides = [1, 1]} : vector<4x640xf32> to vector<4x512xf32>
    %11 = vector.broadcast %9 : vector<4x1xf32> to vector<4x512xf32>
    %12 = arith.mulf %10, %11 : vector<4x512xf32>
    %13 = arith.addf %8, %12 : vector<4x512xf32>
    %14 = vector.extract_strided_slice %1 {offsets = [0, 1], sizes = [4, 1], strides = [1, 1]} : vector<4x9xf32> to vector<4x1xf32>
    %15 = vector.extract_strided_slice %6 {offsets = [0, 1], sizes = [4, 512], strides = [1, 1]} : vector<4x640xf32> to vector<4x512xf32>
    %16 = vector.broadcast %14 : vector<4x1xf32> to vector<4x512xf32>
    %17 = arith.mulf %15, %16 : vector<4x512xf32>
    %18 = arith.addf %13, %17 : vector<4x512xf32>
    %19 = vector.extract_strided_slice %1 {offsets = [0, 2], sizes = [4, 1], strides = [1, 1]} : vector<4x9xf32> to vector<4x1xf32>
    %20 = vector.extract_strided_slice %6 {offsets = [0, 2], sizes = [4, 512], strides = [1, 1]} : vector<4x640xf32> to vector<4x512xf32>
    %21 = vector.broadcast %19 : vector<4x1xf32> to vector<4x512xf32>
    %22 = arith.mulf %20, %21 : vector<4x512xf32>
    %23 = arith.addf %18, %22 : vector<4x512xf32>
    %24 = vector.extract_strided_slice %1 {offsets = [0, 3], sizes = [4, 1], strides = [1, 1]} : vector<4x9xf32> to vector<4x1xf32>
    %25 = vector.extract_strided_slice %6 {offsets = [0, 16], sizes = [4, 512], strides = [1, 1]} : vector<4x640xf32> to vector<4x512xf32>
    %26 = vector.broadcast %24 : vector<4x1xf32> to vector<4x512xf32>
    %27 = arith.mulf %25, %26 : vector<4x512xf32>
    %28 = arith.addf %23, %27 : vector<4x512xf32>
    %29 = vector.extract_strided_slice %1 {offsets = [0, 4], sizes = [4, 1], strides = [1, 1]} : vector<4x9xf32> to vector<4x1xf32>
    %30 = vector.extract_strided_slice %6 {offsets = [0, 17], sizes = [4, 512], strides = [1, 1]} : vector<4x640xf32> to vector<4x512xf32>
    %31 = vector.broadcast %29 : vector<4x1xf32> to vector<4x512xf32>
    %32 = arith.mulf %30, %31 : vector<4x512xf32>
    %33 = arith.addf %28, %32 : vector<4x512xf32>
    %34 = vector.extract_strided_slice %1 {offsets = [0, 5], sizes = [4, 1], strides = [1, 1]} : vector<4x9xf32> to vector<4x1xf32>
    %35 = vector.extract_strided_slice %6 {offsets = [0, 18], sizes = [4, 512], strides = [1, 1]} : vector<4x640xf32> to vector<4x512xf32>
    %36 = vector.broadcast %34 : vector<4x1xf32> to vector<4x512xf32>
    %37 = arith.mulf %35, %36 : vector<4x512xf32>
    %38 = arith.addf %33, %37 : vector<4x512xf32>
    %39 = vector.extract_strided_slice %1 {offsets = [0, 6], sizes = [4, 1], strides = [1, 1]} : vector<4x9xf32> to vector<4x1xf32>
    %40 = vector.extract_strided_slice %6 {offsets = [0, 32], sizes = [4, 512], strides = [1, 1]} : vector<4x640xf32> to vector<4x512xf32>
    %41 = vector.broadcast %39 : vector<4x1xf32> to vector<4x512xf32>
    %42 = arith.mulf %40, %41 : vector<4x512xf32>
    %43 = arith.addf %38, %42 : vector<4x512xf32>
    %44 = vector.extract_strided_slice %1 {offsets = [0, 7], sizes = [4, 1], strides = [1, 1]} : vector<4x9xf32> to vector<4x1xf32>
    %45 = vector.extract_strided_slice %6 {offsets = [0, 33], sizes = [4, 512], strides = [1, 1]} : vector<4x640xf32> to vector<4x512xf32>
    %46 = vector.broadcast %44 : vector<4x1xf32> to vector<4x512xf32>
    %47 = arith.mulf %45, %46 : vector<4x512xf32>
    %48 = arith.addf %43, %47 : vector<4x512xf32>
    %49 = vector.extract_strided_slice %1 {offsets = [0, 8], sizes = [4, 1], strides = [1, 1]} : vector<4x9xf32> to vector<4x1xf32>
    %50 = vector.extract_strided_slice %6 {offsets = [0, 34], sizes = [4, 512], strides = [1, 1]} : vector<4x640xf32> to vector<4x512xf32>
    %51 = vector.broadcast %49 : vector<4x1xf32> to vector<4x512xf32>
    %52 = arith.mulf %50, %51 : vector<4x512xf32>
    %53 = arith.addf %48, %52 : vector<4x512xf32>
    %54 = vector.shape_cast %4 : vector<8x1xf32> to vector<8x1xf32>
    %55 = vector.broadcast %54 : vector<8x1xf32> to vector<8x512xf32>
    %56 = vector.extract_strided_slice %3 {offsets = [0, 0], sizes = [8, 1], strides = [1, 1]} : vector<8x4xf32> to vector<8x1xf32>
    %57 = vector.extract_strided_slice %53 {offsets = [0, 0], sizes = [1, 512], strides = [1, 1]} : vector<4x512xf32> to vector<1x512xf32>
    %58 = vector.broadcast %56 : vector<8x1xf32> to vector<8x512xf32>
    %59 = vector.broadcast %57 : vector<1x512xf32> to vector<8x512xf32>
    %60 = arith.mulf %58, %59 : vector<8x512xf32>
    %61 = arith.addf %55, %60 : vector<8x512xf32>
    %62 = vector.extract_strided_slice %3 {offsets = [0, 1], sizes = [8, 1], strides = [1, 1]} : vector<8x4xf32> to vector<8x1xf32>
    %63 = vector.extract_strided_slice %53 {offsets = [1, 0], sizes = [1, 512], strides = [1, 1]} : vector<4x512xf32> to vector<1x512xf32>
    %64 = vector.broadcast %62 : vector<8x1xf32> to vector<8x512xf32>
    %65 = vector.broadcast %63 : vector<1x512xf32> to vector<8x512xf32>
    %66 = arith.mulf %64, %65 : vector<8x512xf32>
    %67 = arith.addf %61, %66 : vector<8x512xf32>
    %68 = vector.extract_strided_slice %3 {offsets = [0, 2], sizes = [8, 1], strides = [1, 1]} : vector<8x4xf32> to vector<8x1xf32>
    %69 = vector.extract_strided_slice %53 {offsets = [2, 0], sizes = [1, 512], strides = [1, 1]} : vector<4x512xf32> to vector<1x512xf32>
    %70 = vector.broadcast %68 : vector<8x1xf32> to vector<8x512xf32>
    %71 = vector.broadcast %69 : vector<1x512xf32> to vector<8x512xf32>
    %72 = arith.mulf %70, %71 : vector<8x512xf32>
    %73 = arith.addf %67, %72 : vector<8x512xf32>
    %74 = vector.extract_strided_slice %3 {offsets = [0, 3], sizes = [8, 1], strides = [1, 1]} : vector<8x4xf32> to vector<8x1xf32>
    %75 = vector.extract_strided_slice %53 {offsets = [3, 0], sizes = [1, 512], strides = [1, 1]} : vector<4x512xf32> to vector<1x512xf32>
    %76 = vector.broadcast %74 : vector<8x1xf32> to vector<8x512xf32>
    %77 = vector.broadcast %75 : vector<1x512xf32> to vector<8x512xf32>
    %78 = arith.mulf %76, %77 : vector<8x512xf32>
    %79 = arith.addf %73, %78 : vector<8x512xf32>
    %c0_9 = arith.constant 0 : index
    %c0_10 = arith.constant 0 : index
    %80 = vector.load %arg6[%c0_9, %c0_10] : memref<8x512xf32, #tpu.memory_space<vmem>>, vector<8x512xf32>
    tpu.vector_store %arg6[%c0_9, %c0_10], %79 {strides = array<i32>} : memref<8x512xf32, #tpu.memory_space<vmem>>, vector<8x512xf32>,
    return
  }
  func.func @transform_0(%arg0: i32) -> (i32, i32) {
    %c0_i32 = arith.constant 0 : i32
    %c0_i32_0 = arith.constant 0 : i32
    return %c0_i32, %arg0 : i32, i32
  }
  func.func @transform_1(%arg0: i32) -> (i32, i32) {
    %c0_i32 = arith.constant 0 : i32
    %c0_i32_0 = arith.constant 0 : i32
    %c0_i32_1 = arith.constant 0 : i32
    return %c0_i32, %c0_i32_0 : i32, i32
  }
  func.func @transform_2(%arg0: i32) -> (i32, i32) {
    %c0_i32 = arith.constant 0 : i32
    %c0_i32_0 = arith.constant 0 : i32
    %c0_i32_1 = arith.constant 0 : i32
    return %c0_i32, %c0_i32_0 : i32, i32
  }
  func.func @transform_3(%arg0: i32) -> (i32, i32) {
    %c0_i32 = arith.constant 0 : i32
    %c0_i32_0 = arith.constant 0 : i32
    %c0_i32_1 = arith.constant 0 : i32
    return %c0_i32, %c0_i32_0 : i32, i32
  }
  func.func @transform_4(%arg0: i32) -> (i32, i32) {
    %c0_i32 = arith.constant 0 : i32
    %c0_i32_0 = arith.constant 0 : i32
    %c0_i32_1 = arith.constant 0 : i32
    return %c0_i32, %c0_i32_0 : i32, i32
  }
  func.func @transform_5(%arg0: i32) -> (i32, i32) {
    %c0_i32 = arith.constant 0 : i32
    %c0_i32_0 = arith.constant 0 : i32
    return %c0_i32, %arg0 : i32, i32
  }
}

</mosaic_0001>

<bundles_post_ra>
// kernel: tpu_custom_call.1
= control target key start
LH: loop header
LB: loop body
LE: loop exit
PB: predicated region body
PF: predicated region fallthrough
CT: control target
= control target key end

     0   :  { %v538_v1 = vmov 3   ;;  %v539_v2 = vmov 1   ;;  %s761_s0 = inlined_call_operand.vmem [shape: f32[4,512], index: 0, kind: input, shape index: {}]   ;;  %s762_s1 = inlined_call_operand.vmem [shape: f32[4,9], index: 1, kind: input, shape index: {}]   ;;  %s763_s2 = inlined_call_operand.vmem [shape: f32[4,1], index: 2, kind: input, shape index: {}]   ;;  %s764_s3 = inlined_call_operand.vmem [shape: f32[8,4], index: 3, kind: input, shape index: {}]   ;;  %s765_s4 = inlined_call_operand.vmem [shape: f32[8,1], index: 4, kind: input, shape index: {}]   ;;  %s766_s5 = inlined_call_operand.hbm [shape: f32[8,512], index: 5, kind: output, shape index: {}]  }
   0x1   :  { %v23_v0 = vld [vmem:[%s762_s1] sm:$0xf]  ;;  %502 = vset.pattern.permute.xlu1 %v538_v1  ;;  %501 = vset.pattern.permute.xlu0 %v539_v2 }
   0x2   :  { %126 = vperm.xlu1 %502, %v23_v0   ;;  %52 = vperm.xlu0 %501, %v23_v0  }
   0x3   :  { %10 = vsyncpa [#allocation3], 0  ;;  %v540_v3 = vmov 4   ;;  %v541_v4 = vmov 6   ;;  %v24_v5 = vld [vmem:[%s763_s2] sm:$0xf] }
   0x4   :  { %v542_v6 = vmov 5   ;;  %v543_v7 = vmov 0   ;;  %v26_v8 = vld [vmem:[%s765_s4] sm:$0xff]  ;;  %v544_v9 = vmov 7   ;;  %v545_v10 = vmov 2   ;;  %v614_v15 = vld [vmem:[%s761_s0 + $0x8] sm:$0xff] }
   0x5   :  { %v546_v11 = vmov 8   ;;  %v599_v12 = vld [vmem:[%s764_s3] sm:$0xff]  ;;  %v620_v20 = vcombine.high %v614_v15, %v614_v15  ;;  %s547_s3 = smov 127   ;;  %s549_s27 = smov 112   ;;  %vm75_vm0 = vcmask 1039360   ;;  %vm112_vm1 = vcmask 1031168  }
   0x6   :  { %503 = vset.pattern.permute.xlu1 %v540_v3  ;;  %505 = vset.pattern.permute.xlu0 %v541_v4  ;;  %v605_v13 = vld [vmem:[%s761_s0] sm:$0xff]  ;;  %s548_s0 = smov 126   ;;  %s550_s28 = smov 111   ;;  %vm149_vm2 = vcmask 916480   ;;  %vm186_vm3 = vcmask 908288   ;;  %vm223_vm4 = vcmask 900096  }
   0x7   :  { %163 = vperm.xlu1 %503, %v23_v0   ;;  %237 = vperm.xlu0 %505, %v23_v0   ;;  %v609_v14 = vcombine.high %v605_v13, %v605_v13  ;;  %s551_s29 = smov 110   ;;  %s552_s30 = smov 96   ;;  %vm260_vm5 = vcmask 785408   ;;  %vm297_vm6 = vcmask 777216   ;;  %vm334_vm7 = vcmask 769024  }
   0x8   :  { %s553_s6 = smov 95   ;;  %s554_s7 = smov 94  }
   0x9   :  { %s555_s8 = smov [#allocation2]  }
   0xa   :  { %s475_s9 = sshll.u32 %s555_s8, 4  ;;  %s476_s9 = int_to_ptr.vmem [resolvable:$true] %s475_s9 }
   0xb   :  { %504 = vset.pattern.permute.xlu1 %v542_v6  ;;  %508 = vset.pattern.permute.xlu0 %v543_v7  ;;  %s516_s10 = scalar_lea.vmem %s476_s9, 512  ;;  %p521_p1 = scmp.lt.s32.totalorder %s476_s9, %s476_s9 }
   0xc   :  { %200 = vperm.xlu1 %504, %v23_v0   ;;  %35 = vperm.xlu0 %508, %v24_v5   ;;  %p517_p0 = scmp.ne.s32.totalorder %s476_s9, %s516_s10  ;;  %p522_p2 = scmp.lt.s32.totalorder %s516_s10, %s516_s10 }
   0xe   :  { %p523_p3 = por %p522_p2, %p521_p1 }
  0x10   :  { %506 = vset.pattern.permute.xlu1 %v544_v9  ;;  %349 = vperm.xlu0 %508, %v26_v8   ;;  %p524_p4 = pnand %p523_p3, %p517_p0 }
  0x11   :  { %274 = vperm.xlu1 %506, %v23_v0  }
  0x14   :  { %510 = vset.pattern.permute.xlu0 %v545_v10 }
  0x15   :  { %507 = vset.pattern.permute.xlu1 %v546_v11  ;;  %89 = vperm.xlu0 %510, %v23_v0  }
  0x16   :  { %311 = vperm.xlu1 %507, %v23_v0  }
  0x1a   :  { %509 = vset.pattern.permute.xlu1 %v543_v7 }
  0x1b   :  { %40 = vperm.xlu1 %509, %v23_v0  }
  0x1f   :  { %354 = vperm.xlu1 %509, %v599_v12  }
  0x23   :  { %511 = vset.pattern.permute.xlu1 %v539_v2 }
  0x7d   :  { %v53_v16 = vpop.permute.xlu0 %52  ;;  %v127_v17 = vpop.permute.xlu1 %126 }
  0x7e   :  { %v55_v18 = vmul.f32 %v53_v16, %v605_v13  ;;  %v56_v19 = vmul.f32 %v53_v16, %v609_v14  ;;  %v57_v22 = vmul.f32 %v53_v16, %v614_v15  ;;  %v58_v23 = vmul.f32 %v53_v16, %v620_v20 }
  0x7f   :  { %v59_v25 = vmul.f32 0.0, %v53_v16  ;;  %v129_v37 = vmul.f32 %v127_v17, %v605_v13  ;;  %v131_v47 = vmul.f32 %v127_v17, %v614_v15  ;;  %v130_v48 = vmul.f32 %v127_v17, %v609_v14 }
  0x80   :  { %65 = vrot.lane.b32.xlu1 %v55_v18, %s547_s3  ;;  %67 = vrot.lane.b32.xlu0 %v56_v19, %s547_s3  ;;  %v133_v49 = vmul.f32 0.0, %v127_v17  ;;  %v132_v50 = vmul.f32 %v127_v17, %v620_v20 }
  0x82   :  { %v622_v21 = vpop.permute.xlu0 %237  ;;  %v164_v24 = vpop.permute.xlu1 %163 }
  0x83   :  { %v167_v51 = vmul.f32 %v164_v24, %v609_v14  ;;  %v166_v52 = vmul.f32 %v164_v24, %v605_v13  ;;  %v169_v53 = vmul.f32 %v164_v24, %v620_v20  ;;  %v168_v54 = vmul.f32 %v164_v24, %v614_v15 }
  0x84   :  { %69 = vrot.lane.b32.xlu1 %v57_v22, %s547_s3  ;;  %71 = vrot.lane.b32.xlu0 %v58_v23, %s547_s3  ;;  %v170_v56 = vmul.f32 0.0, %v164_v24  ;;  %v241_v61 = vmul.f32 %v622_v21, %v609_v14  ;;  %v240_v62 = vmul.f32 %v622_v21, %v605_v13  ;;  %v243_v63 = vmul.f32 %v622_v21, %v620_v20 }
  0x85   :  { %v242_v0 = vmul.f32 %v622_v21, %v614_v15  ;;  %v244_v3 = vmul.f32 0.0, %v622_v21 }
  0x87   :  { %v36_v26 = vpop.permute.xlu0 %35  ;;  %v201_v27 = vpop.permute.xlu1 %200 }
  0x88   :  { %73 = vrot.lane.b32.xlu1 %v59_v25, %s547_s3  ;;  %v203_v55 = vmul.f32 %v201_v27, %v605_v13  ;;  %v205_v57 = vmul.f32 %v201_v27, %v614_v15  ;;  %v204_v58 = vmul.f32 %v201_v27, %v609_v14  ;;  %v207_v59 = vmul.f32 0.0, %v201_v27 }
  0x89   :  { %v206_v60 = vmul.f32 %v201_v27, %v620_v20 }
  0x8b   :  { %v626_v28 = vpop.permute.xlu0 %349 }
  0x8c   :  { %v628_v29 = vpop.permute.xlu1 %274 }
  0x8d   :  { %v277_v2 = vmul.f32 %v628_v29, %v605_v13  ;;  %v279_v4 = vmul.f32 %v628_v29, %v614_v15  ;;  %v278_v5 = vmul.f32 %v628_v29, %v609_v14  ;;  %v281_v6 = vmul.f32 0.0, %v628_v29 }
  0x8e   :  { %v280_v7 = vmul.f32 %v628_v29, %v620_v20 }
  0x90   :  { %v90_v30 = vpop.permute.xlu0 %89 }
  0x91   :  { %v630_v31 = vpop.permute.xlu1 %311  ;;  %v93_v32 = vmul.f32 %v90_v30, %v609_v14  ;;  %v92_v33 = vmul.f32 %v90_v30, %v605_v13  ;;  %v95_v34 = vmul.f32 %v90_v30, %v620_v20  ;;  %v94_v36 = vmul.f32 %v90_v30, %v614_v15 }
  0x92   :  { %v96_v46 = vmul.f32 0.0, %v90_v30  ;;  %v315_v8 = vmul.f32 %v630_v31, %v609_v14  ;;  %v314_v9 = vmul.f32 %v630_v31, %v605_v13  ;;  %v317_v10 = vmul.f32 %v630_v31, %v620_v20 }
  0x93   :  { %104 = vrot.lane.b32.xlu1 %v93_v32, %s548_s0  ;;  %102 = vrot.lane.b32.xlu0 %v92_v33, %s548_s0  ;;  %v316_v11 = vmul.f32 %v630_v31, %v614_v15  ;;  %v318_v16 = vmul.f32 0.0, %v630_v31 }
  0x96   :  { %v41_v35 = vpop.permute.xlu1 %40 }
  0x97   :  { %v43_v38 = vmul.f32 %v41_v35, %v605_v13  ;;  %v44_v39 = vmul.f32 %v41_v35, %v609_v14  ;;  %v45_v40 = vmul.f32 %v41_v35, %v614_v15  ;;  %v46_v41 = vmul.f32 %v41_v35, %v620_v20  ;;  %108 = vrot.lane.b32.xlu1 %v95_v34, %s548_s0 }
  0x98   :  { %106 = vrot.lane.b32.xlu0 %v94_v36, %s548_s0 }
  0x99   :  { %v641_v42 = vadd.f32 %v43_v38, %v36_v26  ;;  %v643_v43 = vadd.f32 %v44_v39, %v36_v26  ;;  %v645_v44 = vadd.f32 %v45_v40, %v36_v26  ;;  %v647_v45 = vadd.f32 %v46_v41, %v36_v26 }
  0x9a   :  { %v692_v13 = vpop.permute.xlu1 %354 }
  0x9b   :  { %139 = vrot.lane.b32.xlu1 %v129_v37, %s549_s27 }
  0x9c   :  { %110 = vrot.lane.b32.xlu0 %v96_v46, %s548_s0 }
  0x9f   :  { %143 = vrot.lane.b32.xlu1 %v131_v47, %s549_s27 }
  0xa0   :  { %141 = vrot.lane.b32.xlu0 %v130_v48, %s549_s27 }
  0xa3   :  { %147 = vrot.lane.b32.xlu1 %v133_v49, %s549_s27 }
  0xa4   :  { %145 = vrot.lane.b32.xlu0 %v132_v50, %s549_s27 }
  0xa7   :  { %178 = vrot.lane.b32.xlu1 %v167_v51, %s550_s28 }
  0xa8   :  { %176 = vrot.lane.b32.xlu0 %v166_v52, %s550_s28  ;;  %v357_v52 = vlaneseq }
  0xab   :  { %182 = vrot.lane.b32.xlu1 %v169_v53, %s550_s28 }
  0xac   :  { %180 = vrot.lane.b32.xlu0 %v168_v54, %s550_s28 }
  0xaf   :  { %213 = vrot.lane.b32.xlu1 %v203_v55, %s551_s29 }
  0xb0   :  { %184 = vrot.lane.b32.xlu0 %v170_v56, %s550_s28 }
  0xb3   :  { %217 = vrot.lane.b32.xlu1 %v205_v57, %s551_s29 }
  0xb4   :  { %215 = vrot.lane.b32.xlu0 %v204_v58, %s551_s29 }
  0xb7   :  { %221 = vrot.lane.b32.xlu1 %v207_v59, %s551_s29 }
  0xb8   :  { %219 = vrot.lane.b32.xlu0 %v206_v60, %s551_s29 }
  0xbb   :  { %252 = vrot.lane.b32.xlu1 %v241_v61, %s552_s30 }
  0xbc   :  { %250 = vrot.lane.b32.xlu0 %v240_v62, %s552_s30 }
  0xbf   :  { %256 = vrot.lane.b32.xlu1 %v243_v63, %s552_s30 }
  0xc0   :  { %254 = vrot.lane.b32.xlu0 %v242_v0, %s552_s30 }
  0xc3   :  { %287 = vrot.lane.b32.xlu1 %v277_v2, %s553_s6 }
  0xc4   :  { %258 = vrot.lane.b32.xlu0 %v244_v3, %s552_s30 }
  0xc7   :  { %291 = vrot.lane.b32.xlu1 %v279_v4, %s553_s6  ;;  %v715_v4 = vshrl.u32 %v357_v52, 7 }
  0xc8   :  { %289 = vrot.lane.b32.xlu0 %v278_v5, %s553_s6 }
  0xcb   :  { %295 = vrot.lane.b32.xlu1 %v281_v6, %s553_s6 }
  0xcc   :  { %293 = vrot.lane.b32.xlu0 %v280_v7, %s553_s6 }
  0xcf   :  { %326 = vrot.lane.b32.xlu1 %v315_v8, %s554_s7 }
  0xd0   :  { %324 = vrot.lane.b32.xlu0 %v314_v9, %s554_s7 }
  0xd3   :  { %330 = vrot.lane.b32.xlu1 %v317_v10, %s554_s7 }
  0xd4   :  { %328 = vrot.lane.b32.xlu0 %v316_v11, %s554_s7 }
  0xd7   :  { %382 = vperm.xlu1 %511, %v599_v12  }
  0xd8   :  { %332 = vrot.lane.b32.xlu0 %v318_v16, %s554_s7 }
  0xdb   :  { %512 = vset.pattern.permute.xlu1 %v538_v1 }
  0xdc   :  { %410 = vperm.xlu0 %510, %v599_v12   ;;  %438 = vperm.xlu1 %512, %v599_v12  }
  0xe0   :  { %513 = vset.pattern.permute.xlu0 %v538_v1 }
  0xf2   :  { %v66_v14 = vpop.permute.xlu1 %65  ;;  %v68_v17 = vpop.permute.xlu0 %67 }
  0xf3   :  { %v76_v49 = vsel %vm75_vm0, %v66_v14, %v68_v17 }
  0xf4   :  { %v84_v56 = vadd.f32 %v76_v49, %v641_v42 }
  0xf6   :  { %v70_v15 = vpop.permute.xlu1 %69  ;;  %v72_v18 = vpop.permute.xlu0 %71 }
  0xf7   :  { %v77_v50 = vsel %vm75_vm0, %v68_v17, %v70_v15  ;;  %v78_v51 = vsel %vm75_vm0, %v70_v15, %v72_v18 }
  0xf8   :  { %v85_v57 = vadd.f32 %v77_v50, %v643_v43  ;;  %v86_v60 = vadd.f32 %v78_v51, %v645_v44 }
  0xfa   :  { %v74_v19 = vpop.permute.xlu1 %73 }
  0xfb   :  { %v79_v61 = vsel %vm75_vm0, %v72_v18, %v74_v19 }
  0xfc   :  { %v87_v7 = vadd.f32 %v79_v61, %v647_v45 }
 0x105   :  { %v105_v20 = vpop.permute.xlu1 %104  ;;  %v103_v21 = vpop.permute.xlu0 %102 }
 0x106   :  { %v113_v53 = vsel %vm112_vm1, %v103_v21, %v105_v20 }
 0x107   :  { %v121_v0 = vadd.f32 %v113_v53, %v84_v56 }
 0x109   :  { %v109_v22 = vpop.permute.xlu1 %108 }
 0x10a   :  { %v107_v23 = vpop.permute.xlu0 %106 }
 0x10b   :  { %v114_v54 = vsel %vm112_vm1, %v105_v20, %v107_v23  ;;  %v115_v58 = vsel %vm112_vm1, %v107_v23, %v109_v22 }
 0x10c   :  { %v122_v2 = vadd.f32 %v114_v54, %v85_v57  ;;  %v123_v42 = vadd.f32 %v115_v58, %v86_v60  ;;  %v359_v57 = vsub.s32 0, %v715_v4 }
 0x10d   :  { %v140_v24 = vpop.permute.xlu1 %139 }
 0x10e   :  { %v111_v25 = vpop.permute.xlu0 %110 }
 0x10f   :  { %v116_v43 = vsel %vm112_vm1, %v109_v22, %v111_v25 }
 0x110   :  { %v124_v18 = vadd.f32 %v116_v43, %v87_v7  ;;  %v415_v43 = vsub.s32 2, %v715_v4 }
 0x111   :  { %v144_v26 = vpop.permute.xlu1 %143 }
 0x112   :  { %v142_v27 = vpop.permute.xlu0 %141 }
 0x113   :  { %v150_v62 = vsel %vm149_vm2, %v140_v24, %v142_v27  ;;  %v151_v63 = vsel %vm149_vm2, %v142_v27, %v144_v26 }
 0x114   :  { %v158_v8 = vadd.f32 %v150_v62, %v121_v0  ;;  %v159_v9 = vadd.f32 %v151_v63, %v122_v2  ;;  %v387_v0 = vsub.s32 1, %v715_v4 }
 0x115   :  { %v148_v29 = vpop.permute.xlu1 %147 }
 0x116   :  { %v146_v30 = vpop.permute.xlu0 %145 }
 0x117   :  { %v152_v3 = vsel %vm149_vm2, %v144_v26, %v146_v30  ;;  %v153_v16 = vsel %vm149_vm2, %v146_v30, %v148_v29 }
 0x118   :  { %v160_v14 = vadd.f32 %v152_v3, %v123_v42  ;;  %v161_v26 = vadd.f32 %v153_v16, %v124_v18 }
 0x119   :  { %v179_v12 = vpop.permute.xlu1 %178 }
 0x11a   :  { %v177_v31 = vpop.permute.xlu0 %176 }
 0x11b   :  { %v187_v5 = vsel %vm186_vm3, %v177_v31, %v179_v12 }
 0x11c   :  { %v195_v19 = vadd.f32 %v187_v5, %v158_v8  ;;  %v443_v5 = vsub.s32 3, %v715_v4 }
 0x11d   :  { %v183_v1 = vpop.permute.xlu1 %182 }
 0x11e   :  { %v181_v32 = vpop.permute.xlu0 %180 }
 0x11f   :  { %v188_v6 = vsel %vm186_vm3, %v179_v12, %v181_v32  ;;  %v189_v10 = vsel %vm186_vm3, %v181_v32, %v183_v1 }
 0x120   :  { %v196_v20 = vadd.f32 %v188_v6, %v159_v9  ;;  %v197_v22 = vadd.f32 %v189_v10, %v160_v14 }
 0x121   :  { %v214_v33 = vpop.permute.xlu1 %213 }
 0x122   :  { %v185_v34 = vpop.permute.xlu0 %184 }
 0x123   :  { %v190_v45 = vsel %vm186_vm3, %v183_v1, %v185_v34 }
 0x124   :  { %v198_v34 = vadd.f32 %v190_v45, %v161_v26 }
 0x125   :  { %v218_v35 = vpop.permute.xlu1 %217 }
 0x126   :  { %v216_v36 = vpop.permute.xlu0 %215 }
 0x127   :  { %v224_v17 = vsel %vm223_vm4, %v214_v33, %v216_v36  ;;  %v225_v15 = vsel %vm223_vm4, %v216_v36, %v218_v35 }
 0x128   :  { %v232_v27 = vadd.f32 %v224_v17, %v195_v19  ;;  %v233_v29 = vadd.f32 %v225_v15, %v196_v20 }
 0x129   :  { %v694_v37 = vpop.permute.xlu1 %221 }
 0x12a   :  { %v696_v38 = vpop.permute.xlu0 %219 }
 0x12b   :  { %v226_v21 = vsel %vm223_vm4, %v218_v35, %v696_v38  ;;  %v227_v31 = vsel %vm223_vm4, %v696_v38, %v694_v37 }
 0x12c   :  { %v234_v32 = vadd.f32 %v226_v21, %v197_v22  ;;  %v235_v51 = vadd.f32 %v227_v31, %v198_v34 }
 0x12d   :  { %v253_v39 = vpop.permute.xlu1 %252 }
 0x12e   :  { %v251_v40 = vpop.permute.xlu0 %250 }
 0x12f   :  { %v261_v23 = vsel %vm260_vm5, %v251_v40, %v253_v39 }
 0x130   :  { %v269_v35 = vadd.f32 %v261_v23, %v232_v27 }
 0x131   :  { %v698_v41 = vpop.permute.xlu1 %256 }
 0x132   :  { %v255_v46 = vpop.permute.xlu0 %254 }
 0x133   :  { %v262_v24 = vsel %vm260_vm5, %v253_v39, %v255_v46  ;;  %v263_v30 = vsel %vm260_vm5, %v255_v46, %v698_v41 }
 0x134   :  { %v270_v36 = vadd.f32 %v262_v24, %v233_v29  ;;  %v271_v40 = vadd.f32 %v263_v30, %v234_v32 }
 0x135   :  { %v288_v47 = vpop.permute.xlu1 %287 }
 0x136   :  { %v700_v48 = vpop.permute.xlu0 %258 }
 0x137   :  { %v264_v46 = vsel %vm260_vm5, %v698_v41, %v700_v48 }
 0x139   :  { %v292_v55 = vpop.permute.xlu1 %291 }
 0x13a   :  { %v290_v59 = vpop.permute.xlu0 %289 }
 0x13b   :  { %v298_v33 = vsel %vm297_vm6, %v288_v47, %v290_v59  ;;  %v299_v1 = vsel %vm297_vm6, %v290_v59, %v292_v55 }
 0x13c   :  { %v306_v37 = vadd.f32 %v298_v33, %v269_v35  ;;  %v307_v38 = vadd.f32 %v299_v1, %v270_v36 }
 0x13d   :  { %v296_v44 = vpop.permute.xlu1 %295 }
 0x13e   :  { %v294_v11 = vpop.permute.xlu0 %293 }
 0x13f   :  { %v300_v39 = vsel %vm297_vm6, %v292_v55, %v294_v11  ;;  %v301_v47 = vsel %vm297_vm6, %v294_v11, %v296_v44  ;;  %v272_v55 = vadd.f32 %v264_v46, %v235_v51 }
 0x140   :  { %v308_v53 = vadd.f32 %v300_v39, %v271_v40 }
 0x141   :  { %v327_v25 = vpop.permute.xlu1 %326  ;;  %v309_v48 = vadd.f32 %v301_v47, %v272_v55 }
 0x142   :  { %v325_v12 = vpop.permute.xlu0 %324 }
 0x143   :  { %v335_v49 = vsel %vm334_vm7, %v325_v12, %v327_v25 }
 0x144   :  { %v343_v58 = vadd.f32 %v335_v49, %v306_v37 }
 0x145   :  { %v331_v50 = vpop.permute.xlu1 %330 }
 0x146   :  { %v329_v52 = vpop.permute.xlu0 %328  ;;  %v360_v62 = vrot.slane %v343_v58, %v359_v57  ;;  %v388_v6 = vrot.slane %v343_v58, %v387_v0  ;;  %v416_v4 = vrot.slane %v343_v58, %v415_v43  ;;  %v444_v22 = vrot.slane %v343_v58, %v443_v5 }
 0x147   :  { %v336_v54 = vsel %vm334_vm7, %v327_v25, %v329_v52  ;;  %v337_v56 = vsel %vm334_vm7, %v329_v52, %v331_v50 }
 0x148   :  { %v344_v59 = vadd.f32 %v336_v54, %v307_v38  ;;  %v345_v41 = vadd.f32 %v337_v56, %v308_v53  ;;  %v373_v8 = vmul.f32 %v360_v62, %v692_v13 }
 0x14a   :  { %v333_v60 = vpop.permute.xlu0 %332  ;;  %v364_v2 = vrot.slane %v344_v59, %v359_v57  ;;  %v368_v3 = vrot.slane %v345_v41, %v359_v57  ;;  %v392_v44 = vrot.slane %v344_v59, %v387_v0  ;;  %v396_v7 = vrot.slane %v345_v41, %v387_v0 }
 0x14b   :  { %v338_v61 = vsel %vm334_vm7, %v331_v50, %v333_v60  ;;  %v377_v20 = vadd.f32 %v373_v8, %v626_v28  ;;  %v424_v21 = vrot.slane %v345_v41, %v415_v43  ;;  %v420_v25 = vrot.slane %v344_v59, %v415_v43 }
 0x14c   :  { %v346_v63 = vadd.f32 %v338_v61, %v309_v48  ;;  %v375_v10 = vmul.f32 %v368_v3, %v692_v13  ;;  %v374_v16 = vmul.f32 %v364_v2, %v692_v13  ;;  %v448_v27 = vrot.slane %v344_v59, %v443_v5 }
 0x14e   :  { %v372_v42 = vrot.slane %v346_v63, %v359_v57  ;;  %v400_v9 = vrot.slane %v346_v63, %v387_v0  ;;  %v379_v45 = vadd.f32 %v375_v10, %v626_v28  ;;  %v378_v24 = vadd.f32 %v374_v16, %v626_v28 }
 0x14f   :  { %v428_v26 = vrot.slane %v346_v63, %v415_v43  ;;  %v456_v29 = vrot.slane %v346_v63, %v443_v5 }
 0x150   :  { %v376_v11 = vmul.f32 %v372_v42, %v692_v13  ;;  %v452_v13 = vrot.slane %v345_v41, %v443_v5 }
 0x152   :  { %v383_v14 = vpop.permute.xlu1 %382  ;;  %v380_v23 = vadd.f32 %v376_v11, %v626_v28 }
 0x153   :  { %v401_v17 = vmul.f32 %v388_v6, %v383_v14  ;;  %v402_v15 = vmul.f32 %v392_v44, %v383_v14  ;;  %v403_v18 = vmul.f32 %v396_v7, %v383_v14  ;;  %v404_v19 = vmul.f32 %v400_v9, %v383_v14 }
 0x155   :  { %v405_v30 = vadd.f32 %v401_v17, %v377_v20  ;;  %v407_v12 = vadd.f32 %v403_v18, %v379_v45  ;;  %v408_v31 = vadd.f32 %v404_v19, %v380_v23  ;;  %v406_v33 = vadd.f32 %v402_v15, %v378_v24 }
 0x157   :  { %v411_v32 = vpop.permute.xlu0 %410  ;;  %v439_v1 = vpop.permute.xlu1 %438 }
 0x158   :  { %v429_v34 = vmul.f32 %v416_v4, %v411_v32  ;;  %v430_v35 = vmul.f32 %v420_v25, %v411_v32  ;;  %v431_v36 = vmul.f32 %v424_v21, %v411_v32  ;;  %v432_v39 = vmul.f32 %v428_v26, %v411_v32 }
 0x159   :  { %v457_v40 = vmul.f32 %v444_v22, %v439_v1  ;;  %v458_v46 = vmul.f32 %v448_v27, %v439_v1  ;;  %v459_v49 = vmul.f32 %v452_v13, %v439_v1  ;;  %v460_v50 = vmul.f32 %v456_v29, %v439_v1 }
 0x15a   :  { %v433_v28 = vadd.f32 %v429_v34, %v405_v30  ;;  %v434_v51 = vadd.f32 %v430_v35, %v406_v33  ;;  %v435_v37 = vadd.f32 %v431_v36, %v407_v12  ;;  %v436_v38 = vadd.f32 %v432_v39, %v408_v31 }
 0x15c   :  { %v461_v52 = vadd.f32 %v457_v40, %v433_v28  ;;  %v462_v47 = vadd.f32 %v458_v46, %v434_v51  ;;  %v463_v53 = vadd.f32 %v459_v49, %v435_v37  ;;  %v464_v54 = vadd.f32 %v460_v50, %v436_v38 }
 0x15e   :  { %465 = vst [vmem:[#allocation2] sm:$0xff] %v461_v52  ;;  %466 = vst [vmem:[#allocation2 + $0x8] sm:$0xff] %v462_v47 }
 0x15f   :  { %467 = vst [vmem:[#allocation2 + $0x10] sm:$0xff] %v463_v53  ;;  %468 = vst [vmem:[#allocation2 + $0x18] sm:$0xff] %v464_v54 }
 0x160   :  { %527 = shalt.err (!%p524_p4)
}
 0x161   :  { %478 = dma.vmem_to_hbm [thread:$0]  %s476_s9, 512, %s766_s5, [#allocation3]  }
 0x162   :  { %536 = dma.done.wait [#allocation3], 512  }
 0x163   :  { %537 = vsyncadd [#allocation3], 4294966784 }
 0x164   :  { %482 = vsyncpa [#allocation3], 1 }

</bundles_post_ra>
